<compile_context>
chip_gen: v5e
topology: v5e:2x2
jax: 0.10.0
libtpu: 0.0.40
codegen_flags: <defaults>
</compile_context>

<pallas_src>
import jax
import jax.numpy as jnp
from jax.experimental import pallas as pl
from jax.experimental.pallas import tpu as pltpu

HIDDEN = 128  # hidden width of the scale/translate MLPs (matches nn.Linear(in//2, 128))


def _flow_kernel(x_ref, wa_ref, b1_ref, w2_ref, b2_ref, arb_ref,
                 layers_out_ref, ldj_ref):
    """All coupling layers fused.  With L = num_layers, H = HIDDEN, F = in_features,
    h = F // 2:
      x_ref:          (B, F)
      wa_ref:         (L, F, 2H + h)   [ P[:, :h] @ [w1s | w1t]  |  P[:, h:] ]
      b1_ref:         (L, 1, 2H)       [ b1s | b1t ]
      w2_ref:         (L, 2, H, h)     stack of (w2s, w2t)
      b2_ref:         (L, 2, 1, h)     stack of (b2s, b2t)
      arb_ref:        (L, F + h, F)    rows 0:F = A = P[:, :h] @ Pinv[:h, :],
                                       rows F:  = R_b = Pinv[h:, :]
      layers_out_ref: (L, B, F)        per-layer outputs
      ldj_ref:        (B, 1)           accumulated log|det J|
    """
    x = x_ref[...]                                   # (B, F)
    num_layers = layers_out_ref.shape[0]
    feat = x.shape[1]
    half = feat // 2
    two_h = 2 * HIDDEN

    scale_acc = jnp.zeros((x.shape[0], half), jnp.float32)
    for l in range(num_layers):  # static unroll; all weights stay resident in VMEM
        # one fused matmul: [hidden pre-activation | shuffled right half]
        y = jnp.dot(x, wa_ref[l], preferred_element_type=jnp.float32)   # (B, 2H + h)
        h_act = jnp.maximum(y[:, :two_h] + b1_ref[l], 0.0)              # (B, 2H)
        xb = y[:, two_h:]                                               # (B, h)

        # second layers of the scale / translate nets (128-lane-aligned hidden slices)
        scale = jnp.tanh(
            jnp.dot(h_act[:, :HIDDEN], w2_ref[l, 0],
                    preferred_element_type=jnp.float32) + b2_ref[l, 0])  # (B, h)
        trans = (jnp.dot(h_act[:, HIDDEN:], w2_ref[l, 1],
                         preferred_element_type=jnp.float32) + b2_ref[l, 1])

        # affine coupling on x_b
        xb_new = xb * jnp.exp(scale) + trans

        # un-shuffle without concat: x_next = x @ A + xb_new @ R_b
        ar = arb_ref[l]                                                 # (F + h, F)
        x = (jnp.dot(x, ar[:feat, :], preferred_element_type=jnp.float32)
             + jnp.dot(xb_new, ar[feat:, :], preferred_element_type=jnp.float32))
        layers_out_ref[l] = x

        # defer the cross-lane reduce: accumulate scale element-wise
        scale_acc = scale_acc + scale

    ldj_ref[...] = jnp.sum(scale_acc, axis=1, keepdims=True)


def _init_linear(key, fan_in, fan_out):
    # mimic nn.Linear default init: U(-1/sqrt(fan_in), 1/sqrt(fan_in))
    kw, kb = jax.random.split(key)
    bound = 1.0 / (fan_in ** 0.5)
    w = jax.random.uniform(kw, (fan_in, fan_out), jnp.float32, -bound, bound)
    b = jax.random.uniform(kb, (1, fan_out), jnp.float32, -bound, bound)
    return w, b


def init_flow(key, in_features, num_layers=4):
    """Returns (packed kernel-ready params, raw per-layer params for the reference)."""
    half = in_features // 2
    raw = []
    Wa, B1, W2, B2, ARb = [], [], [], [], []
    for _ in range(num_layers):
        key, k1, k2, k3, k4, kp = jax.random.split(key, 6)
        w1s, b1s = _init_linear(k1, half, HIDDEN)
        w2s, b2s = _init_linear(k2, HIDDEN, half)
        w1t, b1t = _init_linear(k3, half, HIDDEN)
        w2t, b2t = _init_linear(k4, HIDDEN, half)
        perm = jax.random.permutation(kp, in_features)
        raw.append(dict(w1s=w1s, b1s=b1s, w2s=w2s, b2s=b2s,
                        w1t=w1t, b1t=b1t, w2t=w2t, b2t=b2t, perm=perm))

        # permutation matrix:  (x @ P)[:, j] == x[:, perm[j]];   Pinv = P^T
        p_mat = jax.nn.one_hot(perm, in_features, dtype=jnp.float32).T   # (F, F)
        pinv = p_mat.T

        # fold left-half shuffle into the fused first-layer weight (exact: 0/1 matrix)
        w1 = jnp.concatenate([w1s, w1t], axis=1)                         # (h, 2H)
        w1p = p_mat[:, :half] @ w1                                       # (F, 2H)
        p_b = p_mat[:, half:]                                            # (F, h)
        Wa.append(jnp.concatenate([w1p, p_b], axis=1))                   # (F, 2H + h)
        B1.append(jnp.concatenate([b1s, b1t], axis=1))                   # (1, 2H)

        W2.append(jnp.stack([w2s, w2t], axis=0))                         # (2, H, h)
        B2.append(jnp.stack([b2s, b2t], axis=0))                         # (2, 1, h)

        # un-shuffle operators
        a_mat = p_mat[:, :half] @ pinv[:half, :]                         # (F, F)
        r_b = pinv[half:, :]                                             # (h, F)
        ARb.append(jnp.concatenate([a_mat, r_b], axis=0))                # (F + h, F)

    stack = lambda xs: jnp.stack(xs, axis=0)
    packed = dict(Wa=stack(Wa), B1=stack(B1), W2=stack(W2), B2=stack(B2),
                  ARb=stack(ARb))
    return packed, raw


@jax.jit
def _forward_core(x, Wa, B1, W2, B2, ARb):
    B, F = x.shape
    L = Wa.shape[0]
    vmem = pl.BlockSpec(memory_space=pltpu.MemorySpace.VMEM)
    layers_out, ldj = pl.pallas_call(
        _flow_kernel,
        out_shape=(jax.ShapeDtypeStruct((L, B, F), jnp.float32),
                   jax.ShapeDtypeStruct((B, 1), jnp.float32)),
        in_specs=[vmem] * 6,
        out_specs=(vmem, vmem),
    )(x, Wa, B1, W2, B2, ARb)
    return layers_out[L - 1], ldj[:, 0], layers_out


def normalizing_flow_forward(x, packed):
    """Matches NormalizingFlow.forward: returns (x, log_det_jacobian, layer_outputs)."""
    y, ldj, layers_stacked = _forward_core(x, packed["Wa"], packed["B1"],
                                           packed["W2"], packed["B2"], packed["ARb"])
    L = layers_stacked.shape[0]
    layer_outputs = [x] + [layers_stacked[l] for l in range(L)]
    return y, ldj, layer_outputs


def _reference_forward(x, raw):
    """Pure-JAX reference matching the PyTorch module (with the same fixed perms)."""
    half = x.shape[1] // 2
    log_det = jnp.zeros((x.shape[0],), jnp.float32)
    outs = [x]
    for p in raw:
        perm = p["perm"]
        xs = x[:, perm]
        xa, xb = xs[:, :half], xs[:, half:]
        scale = jnp.tanh(
            jnp.maximum(xa @ p["w1s"] + p["b1s"], 0.0) @ p["w2s"] + p["b2s"])
        trans = jnp.maximum(xa @ p["w1t"] + p["b1t"], 0.0) @ p["w2t"] + p["b2t"]
        xb = xb * jnp.exp(scale) + trans
        xs = jnp.concatenate([xa, xb], axis=1)
        x = xs[:, jnp.argsort(perm)]
        outs.append(x)
        log_det = log_det + scale.sum(axis=1)
    return x, log_det, outs


if __name__ == "__main__":
    key = jax.random.PRNGKey(0)
    k_params, k_data = jax.random.split(key)

    in_features = 4   # iris-like feature count
    batch = 8
    num_layers = 4

    packed, raw = init_flow(k_params, in_features, num_layers)
    x = jax.random.normal(k_data, (batch, in_features), jnp.float32)

    y, log_det_jacobian, layer_outputs = normalizing_flow_forward(x, packed)
    jax.block_until_ready(y)
    jax.block_until_ready(log_det_jacobian)
    for lo in layer_outputs:
        jax.block_until_ready(lo)

    assert y.shape == (batch, in_features)
    assert log_det_jacobian.shape == (batch,)
    assert len(layer_outputs) == num_layers + 1

    # sanity-check the fused kernel against a pure-JAX reference of the module math
    y_ref, ld_ref, outs_ref = _reference_forward(x, raw)
    assert jnp.allclose(y, y_ref, atol=1e-4, rtol=1e-4)
    assert jnp.allclose(log_det_jacobian, ld_ref, atol=1e-4, rtol=1e-4)
    for a, b in zip(layer_outputs, outs_ref):
        assert jnp.allclose(a, b, atol=1e-4, rtol=1e-4)

    print("KERNEL_OK")
</pallas_src>

<mosaic_0001>
module attributes {stable_mosaic.version = 11 : i64} {
  func.func @_flow_kernel(%arg0: memref<8x4xf32, #tpu.memory_space<vmem>>, %arg1: memref<4x4x258xf32, #tpu.memory_space<vmem>>, %arg2: memref<4x1x256xf32, #tpu.memory_space<vmem>>, %arg3: memref<4x2x128x2xf32, #tpu.memory_space<vmem>>, %arg4: memref<4x2x1x2xf32, #tpu.memory_space<vmem>>, %arg5: memref<4x6x4xf32, #tpu.memory_space<vmem>>, %arg6: memref<4x8x4xf32, #tpu.memory_space<vmem>>, %arg7: memref<8x1xf32, #tpu.memory_space<vmem>>) attributes {dimension_semantics = [], scalar_prefetch = 0 : i64, scratch_operands = 0 : i64, tpu.core_type = #tpu.core_type<tc>} {
    %c0 = arith.constant 0 : index
    %c0_0 = arith.constant 0 : index
    %0 = vector.load %arg0[%c0, %c0_0] : memref<8x4xf32, #tpu.memory_space<vmem>>, vector<8x4xf32>
    %cst = arith.constant 0.000000e+00 : f32
    %1 = vector.broadcast %cst : f32 to vector<8x2xf32>
    %c0_1 = arith.constant 0 : index
    %c0_2 = arith.constant 0 : index
    %c0_3 = arith.constant 0 : index
    %2 = vector.load %arg1[%c0_1, %c0_2, %c0_3] : memref<4x4x258xf32, #tpu.memory_space<vmem>>, vector<1x4x258xf32>
    %3 = vector.shape_cast %2 : vector<1x4x258xf32> to vector<4x258xf32>
    %cst_4 = arith.constant dense<0.000000e+00> : vector<8x258xf32>
    %4 = tpu.matmul %0, %3, %cst_4 {dimension_numbers = #tpu.dot_dimension_numbers<[1], [0], [0], [1], [0, 0, 1, 1], [], []>} : vector<8x4xf32>, vector<4x258xf32>, vector<8x258xf32> -> vector<8x258xf32>
    %5 = vector.extract_strided_slice %4 {offsets = [0, 0], sizes = [8, 256], strides = [1, 1]} : vector<8x258xf32> to vector<8x256xf32>
    %c0_5 = arith.constant 0 : index
    %c0_6 = arith.constant 0 : index
    %c0_7 = arith.constant 0 : index
    %6 = vector.load %arg2[%c0_5, %c0_6, %c0_7] : memref<4x1x256xf32, #tpu.memory_space<vmem>>, vector<1x1x256xf32>
    %7 = vector.shape_cast %6 : vector<1x1x256xf32> to vector<1x256xf32>
    %8 = vector.broadcast %7 : vector<1x256xf32> to vector<8x256xf32>
    %9 = arith.addf %5, %8 : vector<8x256xf32>
    %cst_8 = arith.constant 0.000000e+00 : f32
    %10 = vector.broadcast %cst_8 : f32 to vector<8x256xf32>
    %11 = arith.maximumf %9, %10 : vector<8x256xf32>
    %12 = vector.extract_strided_slice %4 {offsets = [0, 256], sizes = [8, 2], strides = [1, 1]} : vector<8x258xf32> to vector<8x2xf32>
    %13 = vector.extract_strided_slice %11 {offsets = [0, 0], sizes = [8, 128], strides = [1, 1]} : vector<8x256xf32> to vector<8x128xf32>
    %c0_9 = arith.constant 0 : index
    %c0_10 = arith.constant 0 : index
    %c0_11 = arith.constant 0 : index
    %c0_12 = arith.constant 0 : index
    %14 = vector.load %arg3[%c0_9, %c0_10, %c0_11, %c0_12] : memref<4x2x128x2xf32, #tpu.memory_space<vmem>>, vector<1x1x128x2xf32>
    %15 = vector.shape_cast %14 : vector<1x1x128x2xf32> to vector<128x2xf32>
    %cst_13 = arith.constant dense<0.000000e+00> : vector<8x2xf32>
    %16 = tpu.matmul %13, %15, %cst_13 {dimension_numbers = #tpu.dot_dimension_numbers<[1], [0], [0], [1], [0, 0, 1, 1], [], []>} : vector<8x128xf32>, vector<128x2xf32>, vector<8x2xf32> -> vector<8x2xf32>
    %c0_14 = arith.constant 0 : index
    %c0_15 = arith.constant 0 : index
    %c0_16 = arith.constant 0 : index
    %c0_17 = arith.constant 0 : index
    %17 = vector.load %arg4[%c0_14, %c0_15, %c0_16, %c0_17] : memref<4x2x1x2xf32, #tpu.memory_space<vmem>>, vector<1x1x1x2xf32>
    %18 = vector.shape_cast %17 : vector<1x1x1x2xf32> to vector<1x2xf32>
    %19 = vector.broadcast %18 : vector<1x2xf32> to vector<8x2xf32>
    %20 = arith.addf %16, %19 : vector<8x2xf32>
    %21 = math.tanh %20 : vector<8x2xf32>
    %22 = vector.extract_strided_slice %11 {offsets = [0, 128], sizes = [8, 128], strides = [1, 1]} : vector<8x256xf32> to vector<8x128xf32>
    %c0_18 = arith.constant 0 : index
    %c1 = arith.constant 1 : index
    %c0_19 = arith.constant 0 : index
    %c0_20 = arith.constant 0 : index
    %23 = vector.load %arg3[%c0_18, %c1, %c0_19, %c0_20] : memref<4x2x128x2xf32, #tpu.memory_space<vmem>>, vector<1x1x128x2xf32>
    %24 = vector.shape_cast %23 : vector<1x1x128x2xf32> to vector<128x2xf32>
    %cst_21 = arith.constant dense<0.000000e+00> : vector<8x2xf32>
    %25 = tpu.matmul %22, %24, %cst_21 {dimension_numbers = #tpu.dot_dimension_numbers<[1], [0], [0], [1], [0, 0, 1, 1], [], []>} : vector<8x128xf32>, vector<128x2xf32>, vector<8x2xf32> -> vector<8x2xf32>
    %c0_22 = arith.constant 0 : index
    %c1_23 = arith.constant 1 : index
    %c0_24 = arith.constant 0 : index
    %c0_25 = arith.constant 0 : index
    %26 = vector.load %arg4[%c0_22, %c1_23, %c0_24, %c0_25] : memref<4x2x1x2xf32, #tpu.memory_space<vmem>>, vector<1x1x1x2xf32>
    %27 = vector.shape_cast %26 : vector<1x1x1x2xf32> to vector<1x2xf32>
    %28 = vector.broadcast %27 : vector<1x2xf32> to vector<8x2xf32>
    %29 = arith.addf %25, %28 : vector<8x2xf32>
    %30 = math.exp %21 : vector<8x2xf32>
    %31 = arith.mulf %12, %30 : vector<8x2xf32>
    %32 = arith.addf %31, %29 : vector<8x2xf32>
    %c0_26 = arith.constant 0 : index
    %c0_27 = arith.constant 0 : index
    %c0_28 = arith.constant 0 : index
    %33 = vector.load %arg5[%c0_26, %c0_27, %c0_28] : memref<4x6x4xf32, #tpu.memory_space<vmem>>, vector<1x6x4xf32>
    %34 = vector.shape_cast %33 : vector<1x6x4xf32> to vector<6x4xf32>
    %35 = vector.extract_strided_slice %34 {offsets = [0, 0], sizes = [4, 4], strides = [1, 1]} : vector<6x4xf32> to vector<4x4xf32>
    %cst_29 = arith.constant dense<0.000000e+00> : vector<8x4xf32>
    %36 = tpu.matmul %0, %35, %cst_29 {dimension_numbers = #tpu.dot_dimension_numbers<[1], [0], [0], [1], [0, 0, 1, 1], [], []>} : vector<8x4xf32>, vector<4x4xf32>, vector<8x4xf32> -> vector<8x4xf32>
    %37 = vector.extract_strided_slice %34 {offsets = [4, 0], sizes = [2, 4], strides = [1, 1]} : vector<6x4xf32> to vector<2x4xf32>
    %cst_30 = arith.constant dense<0.000000e+00> : vector<8x4xf32>
    %38 = tpu.matmul %32, %37, %cst_30 {dimension_numbers = #tpu.dot_dimension_numbers<[1], [0], [0], [1], [0, 0, 1, 1], [], []>} : vector<8x2xf32>, vector<2x4xf32>, vector<8x4xf32> -> vector<8x4xf32>
    %39 = arith.addf %36, %38 : vector<8x4xf32>
    %c0_31 = arith.constant 0 : index
    %c0_32 = arith.constant 0 : index
    %c0_33 = arith.constant 0 : index
    %40 = vector.load %arg6[%c0_31, %c0_32, %c0_33] : memref<4x8x4xf32, #tpu.memory_space<vmem>>, vector<1x8x4xf32>
    %41 = vector.shape_cast %40 : vector<1x8x4xf32> to vector<8x4xf32>
    %42 = vector.shape_cast %39 : vector<8x4xf32> to vector<1x8x4xf32>
    tpu.vector_store %arg6[%c0_31, %c0_32, %c0_33], %42 {strides = array<i32>} : memref<4x8x4xf32, #tpu.memory_space<vmem>>, vector<1x8x4xf32>,
    %43 = arith.addf %1, %21 : vector<8x2xf32>
    %c1_34 = arith.constant 1 : index
    %c0_35 = arith.constant 0 : index
    %c0_36 = arith.constant 0 : index
    %44 = vector.load %arg1[%c1_34, %c0_35, %c0_36] : memref<4x4x258xf32, #tpu.memory_space<vmem>>, vector<1x4x258xf32>
    %45 = vector.shape_cast %44 : vector<1x4x258xf32> to vector<4x258xf32>
    %cst_37 = arith.constant dense<0.000000e+00> : vector<8x258xf32>
    %46 = tpu.matmul %39, %45, %cst_37 {dimension_numbers = #tpu.dot_dimension_numbers<[1], [0], [0], [1], [0, 0, 1, 1], [], []>} : vector<8x4xf32>, vector<4x258xf32>, vector<8x258xf32> -> vector<8x258xf32>
    %47 = vector.extract_strided_slice %46 {offsets = [0, 0], sizes = [8, 256], strides = [1, 1]} : vector<8x258xf32> to vector<8x256xf32>
    %c1_38 = arith.constant 1 : index
    %c0_39 = arith.constant 0 : index
    %c0_40 = arith.constant 0 : index
    %48 = vector.load %arg2[%c1_38, %c0_39, %c0_40] : memref<4x1x256xf32, #tpu.memory_space<vmem>>, vector<1x1x256xf32>
    %49 = vector.shape_cast %48 : vector<1x1x256xf32> to vector<1x256xf32>
    %50 = vector.broadcast %49 : vector<1x256xf32> to vector<8x256xf32>
    %51 = arith.addf %47, %50 : vector<8x256xf32>
    %cst_41 = arith.constant 0.000000e+00 : f32
    %52 = vector.broadcast %cst_41 : f32 to vector<8x256xf32>
    %53 = arith.maximumf %51, %52 : vector<8x256xf32>
    %54 = vector.extract_strided_slice %46 {offsets = [0, 256], sizes = [8, 2], strides = [1, 1]} : vector<8x258xf32> to vector<8x2xf32>
    %55 = vector.extract_strided_slice %53 {offsets = [0, 0], sizes = [8, 128], strides = [1, 1]} : vector<8x256xf32> to vector<8x128xf32>
    %c1_42 = arith.constant 1 : index
    %c0_43 = arith.constant 0 : index
    %c0_44 = arith.constant 0 : index
    %c0_45 = arith.constant 0 : index
    %56 = vector.load %arg3[%c1_42, %c0_43, %c0_44, %c0_45] : memref<4x2x128x2xf32, #tpu.memory_space<vmem>>, vector<1x1x128x2xf32>
    %57 = vector.shape_cast %56 : vector<1x1x128x2xf32> to vector<128x2xf32>
    %cst_46 = arith.constant dense<0.000000e+00> : vector<8x2xf32>
    %58 = tpu.matmul %55, %57, %cst_46 {dimension_numbers = #tpu.dot_dimension_numbers<[1], [0], [0], [1], [0, 0, 1, 1], [], []>} : vector<8x128xf32>, vector<128x2xf32>, vector<8x2xf32> -> vector<8x2xf32>
    %c1_47 = arith.constant 1 : index
    %c0_48 = arith.constant 0 : index
    %c0_49 = arith.constant 0 : index
    %c0_50 = arith.constant 0 : index
    %59 = vector.load %arg4[%c1_47, %c0_48, %c0_49, %c0_50] : memref<4x2x1x2xf32, #tpu.memory_space<vmem>>, vector<1x1x1x2xf32>
    %60 = vector.shape_cast %59 : vector<1x1x1x2xf32> to vector<1x2xf32>
    %61 = vector.broadcast %60 : vector<1x2xf32> to vector<8x2xf32>
    %62 = arith.addf %58, %61 : vector<8x2xf32>
    %63 = math.tanh %62 : vector<8x2xf32>
    %64 = vector.extract_strided_slice %53 {offsets = [0, 128], sizes = [8, 128], strides = [1, 1]} : vector<8x256xf32> to vector<8x128xf32>
    %c1_51 = arith.constant 1 : index
    %c1_52 = arith.constant 1 : index
    %c0_53 = arith.constant 0 : index
    %c0_54 = arith.constant 0 : index
    %65 = vector.load %arg3[%c1_51, %c1_52, %c0_53, %c0_54] : memref<4x2x128x2xf32, #tpu.memory_space<vmem>>, vector<1x1x128x2xf32>
    %66 = vector.shape_cast %65 : vector<1x1x128x2xf32> to vector<128x2xf32>
    %cst_55 = arith.constant dense<0.000000e+00> : vector<8x2xf32>
    %67 = tpu.matmul %64, %66, %cst_55 {dimension_numbers = #tpu.dot_dimension_numbers<[1], [0], [0], [1], [0, 0, 1, 1], [], []>} : vector<8x128xf32>, vector<128x2xf32>, vector<8x2xf32> -> vector<8x2xf32>
    %c1_56 = arith.constant 1 : index
    %c1_57 = arith.constant 1 : index
    %c0_58 = arith.constant 0 : index
    %c0_59 = arith.constant 0 : index
    %68 = vector.load %arg4[%c1_56, %c1_57, %c0_58, %c0_59] : memref<4x2x1x2xf32, #tpu.memory_space<vmem>>, vector<1x1x1x2xf32>
    %69 = vector.shape_cast %68 : vector<1x1x1x2xf32> to vector<1x2xf32>
    %70 = vector.broadcast %69 : vector<1x2xf32> to vector<8x2xf32>
    %71 = arith.addf %67, %70 : vector<8x2xf32>
    %72 = math.exp %63 : vector<8x2xf32>
    %73 = arith.mulf %54, %72 : vector<8x2xf32>
    %74 = arith.addf %73, %71 : vector<8x2xf32>
    %c1_60 = arith.constant 1 : index
    %c0_61 = arith.constant 0 : index
    %c0_62 = arith.constant 0 : index
    %75 = vector.load %arg5[%c1_60, %c0_61, %c0_62] : memref<4x6x4xf32, #tpu.memory_space<vmem>>, vector<1x6x4xf32>
    %76 = vector.shape_cast %75 : vector<1x6x4xf32> to vector<6x4xf32>
    %77 = vector.extract_strided_slice %76 {offsets = [0, 0], sizes = [4, 4], strides = [1, 1]} : vector<6x4xf32> to vector<4x4xf32>
    %cst_63 = arith.constant dense<0.000000e+00> : vector<8x4xf32>
    %78 = tpu.matmul %39, %77, %cst_63 {dimension_numbers = #tpu.dot_dimension_numbers<[1], [0], [0], [1], [0, 0, 1, 1], [], []>} : vector<8x4xf32>, vector<4x4xf32>, vector<8x4xf32> -> vector<8x4xf32>
    %79 = vector.extract_strided_slice %76 {offsets = [4, 0], sizes = [2, 4], strides = [1, 1]} : vector<6x4xf32> to vector<2x4xf32>
    %cst_64 = arith.constant dense<0.000000e+00> : vector<8x4xf32>
    %80 = tpu.matmul %74, %79, %cst_64 {dimension_numbers = #tpu.dot_dimension_numbers<[1], [0], [0], [1], [0, 0, 1, 1], [], []>} : vector<8x2xf32>, vector<2x4xf32>, vector<8x4xf32> -> vector<8x4xf32>
    %81 = arith.addf %78, %80 : vector<8x4xf32>
    %c1_65 = arith.constant 1 : index
    %c0_66 = arith.constant 0 : index
    %c0_67 = arith.constant 0 : index
    %82 = vector.load %arg6[%c1_65, %c0_66, %c0_67] : memref<4x8x4xf32, #tpu.memory_space<vmem>>, vector<1x8x4xf32>
    %83 = vector.shape_cast %82 : vector<1x8x4xf32> to vector<8x4xf32>
    %84 = vector.shape_cast %81 : vector<8x4xf32> to vector<1x8x4xf32>
    tpu.vector_store %arg6[%c1_65, %c0_66, %c0_67], %84 {strides = array<i32>} : memref<4x8x4xf32, #tpu.memory_space<vmem>>, vector<1x8x4xf32>,
    %85 = arith.addf %43, %63 : vector<8x2xf32>
    %c2 = arith.constant 2 : index
    %c0_68 = arith.constant 0 : index
    %c0_69 = arith.constant 0 : index
    %86 = vector.load %arg1[%c2, %c0_68, %c0_69] : memref<4x4x258xf32, #tpu.memory_space<vmem>>, vector<1x4x258xf32>
    %87 = vector.shape_cast %86 : vector<1x4x258xf32> to vector<4x258xf32>
    %cst_70 = arith.constant dense<0.000000e+00> : vector<8x258xf32>
    %88 = tpu.matmul %81, %87, %cst_70 {dimension_numbers = #tpu.dot_dimension_numbers<[1], [0], [0], [1], [0, 0, 1, 1], [], []>} : vector<8x4xf32>, vector<4x258xf32>, vector<8x258xf32> -> vector<8x258xf32>
    %89 = vector.extract_strided_slice %88 {offsets = [0, 0], sizes = [8, 256], strides = [1, 1]} : vector<8x258xf32> to vector<8x256xf32>
    %c2_71 = arith.constant 2 : index
    %c0_72 = arith.constant 0 : index
    %c0_73 = arith.constant 0 : index
    %90 = vector.load %arg2[%c2_71, %c0_72, %c0_73] : memref<4x1x256xf32, #tpu.memory_space<vmem>>, vector<1x1x256xf32>
    %91 = vector.shape_cast %90 : vector<1x1x256xf32> to vector<1x256xf32>
    %92 = vector.broadcast %91 : vector<1x256xf32> to vector<8x256xf32>
    %93 = arith.addf %89, %92 : vector<8x256xf32>
    %cst_74 = arith.constant 0.000000e+00 : f32
    %94 = vector.broadcast %cst_74 : f32 to vector<8x256xf32>
    %95 = arith.maximumf %93, %94 : vector<8x256xf32>
    %96 = vector.extract_strided_slice %88 {offsets = [0, 256], sizes = [8, 2], strides = [1, 1]} : vector<8x258xf32> to vector<8x2xf32>
    %97 = vector.extract_strided_slice %95 {offsets = [0, 0], sizes = [8, 128], strides = [1, 1]} : vector<8x256xf32> to vector<8x128xf32>
    %c2_75 = arith.constant 2 : index
    %c0_76 = arith.constant 0 : index
    %c0_77 = arith.constant 0 : index
    %c0_78 = arith.constant 0 : index
    %98 = vector.load %arg3[%c2_75, %c0_76, %c0_77, %c0_78] : memref<4x2x128x2xf32, #tpu.memory_space<vmem>>, vector<1x1x128x2xf32>
    %99 = vector.shape_cast %98 : vector<1x1x128x2xf32> to vector<128x2xf32>
    %cst_79 = arith.constant dense<0.000000e+00> : vector<8x2xf32>
    %100 = tpu.matmul %97, %99, %cst_79 {dimension_numbers = #tpu.dot_dimension_numbers<[1], [0], [0], [1], [0, 0, 1, 1], [], []>} : vector<8x128xf32>, vector<128x2xf32>, vector<8x2xf32> -> vector<8x2xf32>
    %c2_80 = arith.constant 2 : index
    %c0_81 = arith.constant 0 : index
    %c0_82 = arith.constant 0 : index
    %c0_83 = arith.constant 0 : index
    %101 = vector.load %arg4[%c2_80, %c0_81, %c0_82, %c0_83] : memref<4x2x1x2xf32, #tpu.memory_space<vmem>>, vector<1x1x1x2xf32>
    %102 = vector.shape_cast %101 : vector<1x1x1x2xf32> to vector<1x2xf32>
    %103 = vector.broadcast %102 : vector<1x2xf32> to vector<8x2xf32>
    %104 = arith.addf %100, %103 : vector<8x2xf32>
    %105 = math.tanh %104 : vector<8x2xf32>
    %106 = vector.extract_strided_slice %95 {offsets = [0, 128], sizes = [8, 128], strides = [1, 1]} : vector<8x256xf32> to vector<8x128xf32>
    %c2_84 = arith.constant 2 : index
    %c1_85 = arith.constant 1 : index
    %c0_86 = arith.constant 0 : index
    %c0_87 = arith.constant 0 : index
    %107 = vector.load %arg3[%c2_84, %c1_85, %c0_86, %c0_87] : memref<4x2x128x2xf32, #tpu.memory_space<vmem>>, vector<1x1x128x2xf32>
    %108 = vector.shape_cast %107 : vector<1x1x128x2xf32> to vector<128x2xf32>
    %cst_88 = arith.constant dense<0.000000e+00> : vector<8x2xf32>
    %109 = tpu.matmul %106, %108, %cst_88 {dimension_numbers = #tpu.dot_dimension_numbers<[1], [0], [0], [1], [0, 0, 1, 1], [], []>} : vector<8x128xf32>, vector<128x2xf32>, vector<8x2xf32> -> vector<8x2xf32>
    %c2_89 = arith.constant 2 : index
    %c1_90 = arith.constant 1 : index
    %c0_91 = arith.constant 0 : index
    %c0_92 = arith.constant 0 : index
    %110 = vector.load %arg4[%c2_89, %c1_90, %c0_91, %c0_92] : memref<4x2x1x2xf32, #tpu.memory_space<vmem>>, vector<1x1x1x2xf32>
    %111 = vector.shape_cast %110 : vector<1x1x1x2xf32> to vector<1x2xf32>
    %112 = vector.broadcast %111 : vector<1x2xf32> to vector<8x2xf32>
    %113 = arith.addf %109, %112 : vector<8x2xf32>
    %114 = math.exp %105 : vector<8x2xf32>
    %115 = arith.mulf %96, %114 : vector<8x2xf32>
    %116 = arith.addf %115, %113 : vector<8x2xf32>
    %c2_93 = arith.constant 2 : index
    %c0_94 = arith.constant 0 : index
    %c0_95 = arith.constant 0 : index
    %117 = vector.load %arg5[%c2_93, %c0_94, %c0_95] : memref<4x6x4xf32, #tpu.memory_space<vmem>>, vector<1x6x4xf32>
    %118 = vector.shape_cast %117 : vector<1x6x4xf32> to vector<6x4xf32>
    %119 = vector.extract_strided_slice %118 {offsets = [0, 0], sizes = [4, 4], strides = [1, 1]} : vector<6x4xf32> to vector<4x4xf32>
    %cst_96 = arith.constant dense<0.000000e+00> : vector<8x4xf32>
    %120 = tpu.matmul %81, %119, %cst_96 {dimension_numbers = #tpu.dot_dimension_numbers<[1], [0], [0], [1], [0, 0, 1, 1], [], []>} : vector<8x4xf32>, vector<4x4xf32>, vector<8x4xf32> -> vector<8x4xf32>
    %121 = vector.extract_strided_slice %118 {offsets = [4, 0], sizes = [2, 4], strides = [1, 1]} : vector<6x4xf32> to vector<2x4xf32>
    %cst_97 = arith.constant dense<0.000000e+00> : vector<8x4xf32>
    %122 = tpu.matmul %116, %121, %cst_97 {dimension_numbers = #tpu.dot_dimension_numbers<[1], [0], [0], [1], [0, 0, 1, 1], [], []>} : vector<8x2xf32>, vector<2x4xf32>, vector<8x4xf32> -> vector<8x4xf32>
    %123 = arith.addf %120, %122 : vector<8x4xf32>
    %c2_98 = arith.constant 2 : index
    %c0_99 = arith.constant 0 : index
    %c0_100 = arith.constant 0 : index
    %124 = vector.load %arg6[%c2_98, %c0_99, %c0_100] : memref<4x8x4xf32, #tpu.memory_space<vmem>>, vector<1x8x4xf32>
    %125 = vector.shape_cast %124 : vector<1x8x4xf32> to vector<8x4xf32>
    %126 = vector.shape_cast %123 : vector<8x4xf32> to vector<1x8x4xf32>
    tpu.vector_store %arg6[%c2_98, %c0_99, %c0_100], %126 {strides = array<i32>} : memref<4x8x4xf32, #tpu.memory_space<vmem>>, vector<1x8x4xf32>,
    %127 = arith.addf %85, %105 : vector<8x2xf32>
    %c3 = arith.constant 3 : index
    %c0_101 = arith.constant 0 : index
    %c0_102 = arith.constant 0 : index
    %128 = vector.load %arg1[%c3, %c0_101, %c0_102] : memref<4x4x258xf32, #tpu.memory_space<vmem>>, vector<1x4x258xf32>
    %129 = vector.shape_cast %128 : vector<1x4x258xf32> to vector<4x258xf32>
    %cst_103 = arith.constant dense<0.000000e+00> : vector<8x258xf32>
    %130 = tpu.matmul %123, %129, %cst_103 {dimension_numbers = #tpu.dot_dimension_numbers<[1], [0], [0], [1], [0, 0, 1, 1], [], []>} : vector<8x4xf32>, vector<4x258xf32>, vector<8x258xf32> -> vector<8x258xf32>
    %131 = vector.extract_strided_slice %130 {offsets = [0, 0], sizes = [8, 256], strides = [1, 1]} : vector<8x258xf32> to vector<8x256xf32>
    %c3_104 = arith.constant 3 : index
    %c0_105 = arith.constant 0 : index
    %c0_106 = arith.constant 0 : index
    %132 = vector.load %arg2[%c3_104, %c0_105, %c0_106] : memref<4x1x256xf32, #tpu.memory_space<vmem>>, vector<1x1x256xf32>
    %133 = vector.shape_cast %132 : vector<1x1x256xf32> to vector<1x256xf32>
    %134 = vector.broadcast %133 : vector<1x256xf32> to vector<8x256xf32>
    %135 = arith.addf %131, %134 : vector<8x256xf32>
    %cst_107 = arith.constant 0.000000e+00 : f32
    %136 = vector.broadcast %cst_107 : f32 to vector<8x256xf32>
    %137 = arith.maximumf %135, %136 : vector<8x256xf32>
    %138 = vector.extract_strided_slice %130 {offsets = [0, 256], sizes = [8, 2], strides = [1, 1]} : vector<8x258xf32> to vector<8x2xf32>
    %139 = vector.extract_strided_slice %137 {offsets = [0, 0], sizes = [8, 128], strides = [1, 1]} : vector<8x256xf32> to vector<8x128xf32>
    %c3_108 = arith.constant 3 : index
    %c0_109 = arith.constant 0 : index
    %c0_110 = arith.constant 0 : index
    %c0_111 = arith.constant 0 : index
    %140 = vector.load %arg3[%c3_108, %c0_109, %c0_110, %c0_111] : memref<4x2x128x2xf32, #tpu.memory_space<vmem>>, vector<1x1x128x2xf32>
    %141 = vector.shape_cast %140 : vector<1x1x128x2xf32> to vector<128x2xf32>
    %cst_112 = arith.constant dense<0.000000e+00> : vector<8x2xf32>
    %142 = tpu.matmul %139, %141, %cst_112 {dimension_numbers = #tpu.dot_dimension_numbers<[1], [0], [0], [1], [0, 0, 1, 1], [], []>} : vector<8x128xf32>, vector<128x2xf32>, vector<8x2xf32> -> vector<8x2xf32>
    %c3_113 = arith.constant 3 : index
    %c0_114 = arith.constant 0 : index
    %c0_115 = arith.constant 0 : index
    %c0_116 = arith.constant 0 : index
    %143 = vector.load %arg4[%c3_113, %c0_114, %c0_115, %c0_116] : memref<4x2x1x2xf32, #tpu.memory_space<vmem>>, vector<1x1x1x2xf32>
    %144 = vector.shape_cast %143 : vector<1x1x1x2xf32> to vector<1x2xf32>
    %145 = vector.broadcast %144 : vector<1x2xf32> to vector<8x2xf32>
    %146 = arith.addf %142, %145 : vector<8x2xf32>
    %147 = math.tanh %146 : vector<8x2xf32>
    %148 = vector.extract_strided_slice %137 {offsets = [0, 128], sizes = [8, 128], strides = [1, 1]} : vector<8x256xf32> to vector<8x128xf32>
    %c3_117 = arith.constant 3 : index
    %c1_118 = arith.constant 1 : index
    %c0_119 = arith.constant 0 : index
    %c0_120 = arith.constant 0 : index
    %149 = vector.load %arg3[%c3_117, %c1_118, %c0_119, %c0_120] : memref<4x2x128x2xf32, #tpu.memory_space<vmem>>, vector<1x1x128x2xf32>
    %150 = vector.shape_cast %149 : vector<1x1x128x2xf32> to vector<128x2xf32>
    %cst_121 = arith.constant dense<0.000000e+00> : vector<8x2xf32>
    %151 = tpu.matmul %148, %150, %cst_121 {dimension_numbers = #tpu.dot_dimension_numbers<[1], [0], [0], [1], [0, 0, 1, 1], [], []>} : vector<8x128xf32>, vector<128x2xf32>, vector<8x2xf32> -> vector<8x2xf32>
    %c3_122 = arith.constant 3 : index
    %c1_123 = arith.constant 1 : index
    %c0_124 = arith.constant 0 : index
    %c0_125 = arith.constant 0 : index
    %152 = vector.load %arg4[%c3_122, %c1_123, %c0_124, %c0_125] : memref<4x2x1x2xf32, #tpu.memory_space<vmem>>, vector<1x1x1x2xf32>
    %153 = vector.shape_cast %152 : vector<1x1x1x2xf32> to vector<1x2xf32>
    %154 = vector.broadcast %153 : vector<1x2xf32> to vector<8x2xf32>
    %155 = arith.addf %151, %154 : vector<8x2xf32>
    %156 = math.exp %147 : vector<8x2xf32>
    %157 = arith.mulf %138, %156 : vector<8x2xf32>
    %158 = arith.addf %157, %155 : vector<8x2xf32>
    %c3_126 = arith.constant 3 : index
    %c0_127 = arith.constant 0 : index
    %c0_128 = arith.constant 0 : index
    %159 = vector.load %arg5[%c3_126, %c0_127, %c0_128] : memref<4x6x4xf32, #tpu.memory_space<vmem>>, vector<1x6x4xf32>
    %160 = vector.shape_cast %159 : vector<1x6x4xf32> to vector<6x4xf32>
    %161 = vector.extract_strided_slice %160 {offsets = [0, 0], sizes = [4, 4], strides = [1, 1]} : vector<6x4xf32> to vector<4x4xf32>
    %cst_129 = arith.constant dense<0.000000e+00> : vector<8x4xf32>
    %162 = tpu.matmul %123, %161, %cst_129 {dimension_numbers = #tpu.dot_dimension_numbers<[1], [0], [0], [1], [0, 0, 1, 1], [], []>} : vector<8x4xf32>, vector<4x4xf32>, vector<8x4xf32> -> vector<8x4xf32>
    %163 = vector.extract_strided_slice %160 {offsets = [4, 0], sizes = [2, 4], strides = [1, 1]} : vector<6x4xf32> to vector<2x4xf32>
    %cst_130 = arith.constant dense<0.000000e+00> : vector<8x4xf32>
    %164 = tpu.matmul %158, %163, %cst_130 {dimension_numbers = #tpu.dot_dimension_numbers<[1], [0], [0], [1], [0, 0, 1, 1], [], []>} : vector<8x2xf32>, vector<2x4xf32>, vector<8x4xf32> -> vector<8x4xf32>
    %165 = arith.addf %162, %164 : vector<8x4xf32>
    %c3_131 = arith.constant 3 : index
    %c0_132 = arith.constant 0 : index
    %c0_133 = arith.constant 0 : index
    %166 = vector.load %arg6[%c3_131, %c0_132, %c0_133] : memref<4x8x4xf32, #tpu.memory_space<vmem>>, vector<1x8x4xf32>
    %167 = vector.shape_cast %166 : vector<1x8x4xf32> to vector<8x4xf32>
    %168 = vector.shape_cast %165 : vector<8x4xf32> to vector<1x8x4xf32>
    tpu.vector_store %arg6[%c3_131, %c0_132, %c0_133], %168 {strides = array<i32>} : memref<4x8x4xf32, #tpu.memory_space<vmem>>, vector<1x8x4xf32>,
    %169 = arith.addf %127, %147 : vector<8x2xf32>
    %cst_134 = arith.constant dense<0.000000e+00> : vector<8xf32>
    %170 = vector.multi_reduction <add>, %169, %cst_134 [1] : vector<8x2xf32> to vector<8xf32>
    %171 = vector.shape_cast %170 : vector<8xf32> to vector<8x1xf32>
    %c0_135 = arith.constant 0 : index
    %c0_136 = arith.constant 0 : index
    %172 = vector.load %arg7[%c0_135, %c0_136] : memref<8x1xf32, #tpu.memory_space<vmem>>, vector<8x1xf32>
    tpu.vector_store %arg7[%c0_135, %c0_136], %171 {strides = array<i32>} : memref<8x1xf32, #tpu.memory_space<vmem>>, vector<8x1xf32>,
    return
  }
}

</mosaic_0001>

<bundles_post_ra>
// kernel: _forward_core.1
= control target key start
LH: loop header
LB: loop body
LE: loop exit
PB: predicated region body
PF: predicated region fallthrough
CT: control target
= control target key end

     0   :  { %vm40_vm0 = vcmask 1043456   ;;  %vm36_vm1 = vcmask 31744   ;;  %vm211_vm2 = vcmask 1041408   ;;  %vm207_vm3 = vcmask 15360   ;;  %s1758_s1 = inlined_call_operand.vmem [shape: f32[4,4,258], index: 1, kind: input, shape index: {}]   ;;  %s1759_s3 = inlined_call_operand.vmem [shape: f32[4,2,128,2], index: 3, kind: input, shape index: {}]   ;;  %s1760_s0 = inlined_call_operand.vmem [shape: f32[8,4], index: 0, kind: input, shape index: {}]   ;;  %s1761_s4 = inlined_call_operand.vmem [shape: f32[4,2,1,2], index: 4, kind: input, shape index: {}]   ;;  %s1762_s2 = inlined_call_operand.vmem [shape: f32[4,1,256], index: 2, kind: input, shape index: {}]   ;;  %s1763_s5 = inlined_call_operand.vmem [shape: f32[4,6,4], index: 5, kind: input, shape index: {}]   ;;  %s1764_s6 = inlined_call_operand.vmem [shape: f32[4,8,4], index: 6, kind: output, shape index: {0}]   ;;  %s1765_s7 = inlined_call_operand.vmem [shape: f32[8,1], index: 7, kind: output, shape index: {1}]  }
   0x1   :  { %v26_v0 = vld [vmem:[%s1758_s1] sm:$0xff]  ;;  %v132_v1 = vld [vmem:[%s1759_s3 + $0x78] sm:$0xff]  ;;  %v131_v2 = vld [vmem:[%s1759_s3 + $0x70] sm:$0xff]  ;;  %vm963_vm4 = vcmask 7168  }
   0x2   :  { %30 = vst [vmem:[#allocation1] ss:$2 sm:$0xff] %v26_v0  ;;  %137 = vmatpush.msra.mxu3 %v132_v1  ;;  %v130_v3 = vld [vmem:[%s1759_s3 + $0x68] sm:$0xff]  ;;  %v129_v4 = vld [vmem:[%s1759_s3 + $0x60] sm:$0xff]  ;;  %v128_v7 = vld [vmem:[%s1759_s3 + $0x58] sm:$0xff] }
   0x3   :  { %v1000_v5 = vld [vmem:[%s1758_s1 + $0xc] sm:$0xff]  ;;  %v1232_v6 = vld [vmem:[%s1760_s0] sm:$0xff]  ;;  %v994_v8 = vld [vmem:[%s1759_s3 + $0xf8] sm:$0xff] }
   0x4   :  { %138 = vmatpush.msra.mxu3 %v131_v2  ;;  %v127_v11 = vld [vmem:[%s1759_s3 + $0x50] sm:$0xff]  ;;  %v126_v12 = vld [vmem:[%s1759_s3 + $0x48] sm:$0xff]  ;;  %v125_v13 = vld [vmem:[%s1759_s3 + $0x40] sm:$0xff] }
   0x5   :  { %v124_v14 = vld [vmem:[%s1759_s3 + $0x38] sm:$0xff]  ;;  %v123_v15 = vld [vmem:[%s1759_s3 + $0x30] sm:$0xff]  ;;  %v122_v16 = vld [vmem:[%s1759_s3 + $0x28] sm:$0xff] }
   0x6   :  { %139 = vmatpush.msra.mxu3 %v130_v3  ;;  %v121_v17 = vld [vmem:[%s1759_s3 + $0x20] sm:$0xff]  ;;  %v120_v18 = vld [vmem:[%s1759_s3 + $0x18] sm:$0xff]  ;;  %v119_v19 = vld [vmem:[%s1759_s3 + $0x10] sm:$0xff] }
   0x7   :  { %v993_v20 = vld [vmem:[%s1759_s3 + $0xf0] sm:$0xff]  ;;  %v118_v21 = vld [vmem:[%s1759_s3 + $0x8] sm:$0xff]  ;;  %v117_v23 = vld [vmem:[%s1759_s3] sm:$0xff] }
   0x8   :  { %140 = vmatpush.msra.mxu3 %v129_v4  ;;  %v992_v22 = vld [vmem:[%s1759_s3 + $0xe8] sm:$0xff]  ;;  %v991_v24 = vld [vmem:[%s1759_s3 + $0xe0] sm:$0xff]  ;;  %v990_v25 = vld [vmem:[%s1759_s3 + $0xd8] sm:$0xff] }
   0x9   :  { %v33_v9 = vld.sshfl [vmem:[#allocation1] sm:$0xff pattern:$0x75316420]  ;;  %v34_v10 = vld.sshfl [vmem:[#allocation1 + $0x8] sm:$0xff pattern:$0x75316420] }
   0xa   :  { %973 = vmatpush.msk.msra.mxu0 %vm40_vm0, %v33_v9  ;;  %975 = vmatpush.msk.msra.mxu2 %vm40_vm0, %v34_v10  ;;  %263 = vst [vmem:[#allocation1] ss:$2 sm:$0xff] %v1000_v5  ;;  %v989_v26 = vld [vmem:[%s1759_s3 + $0xd0] sm:$0xff]  ;;  %v27_v27 = vld [vmem:[%s1758_s1 + $0x8] sm:$0xf]  ;;  %v987_v29 = vld [vmem:[%s1759_s3 + $0xc0] sm:$0xff] }
   0xb   :  { %974 = vmatmul.msk.f32.vlgmr.msra.gmra.mxu0 %vm36_vm1, %v1232_v6  ;;  %976 = vmatmul.msk.f32.vlgmr.msra.gmra.mxu2 %vm36_vm1, %v1232_v6  ;;  %v988_v28 = vld [vmem:[%s1759_s3 + $0xc8] sm:$0xff]  ;;  %32 = vst [vmem:[#allocation1 + $0x10] ss:$2 sm:$0xff] %v27_v27  ;;  %v986_v30 = vld [vmem:[%s1759_s3 + $0xb8] sm:$0xff]  ;;  %v1001_v31 = vld [vmem:[%s1758_s1 + $0x14] sm:$0xf] }
   0xc   :  { %141 = vmatpush.msra.mxu3 %v128_v7  ;;  %180 = vmatpush.msrb.mxu0 %v994_v8  ;;  %v985_v32 = vld [vmem:[%s1759_s3 + $0xb0] sm:$0xff]  ;;  %v984_v34 = vld [vmem:[%s1759_s3 + $0xa8] sm:$0xff]  ;;  %v983_v35 = vld [vmem:[%s1759_s3 + $0xa0] sm:$0xff] }
   0xd   :  { %v982_v36 = vld [vmem:[%s1759_s3 + $0x98] sm:$0xff]  ;;  %v981_v37 = vld [vmem:[%s1759_s3 + $0x90] sm:$0xff]  ;;  %v980_v38 = vld [vmem:[%s1759_s3 + $0x88] sm:$0xff] }
   0xe   :  { %142 = vmatpush.msra.mxu3 %v127_v11  ;;  %181 = vmatpush.msrb.mxu0 %v993_v20  ;;  %v979_v39 = vld [vmem:[%s1759_s3 + $0x80] sm:$0xff]  ;;  %v1049_v1 = vld [vmem:[%s1758_s1 + $0x18] sm:$0xff]  ;;  %v1023_v5 = vld [vmem:[%s1759_s3 + $0x170] sm:$0xff] }
   0xf   :  { %v107_v40 = vld [vmem:[%s1762_s2] sm:$0x3]  ;;  %v1024_v4 = vld [vmem:[%s1759_s3 + $0x178] sm:$0xff]  ;;  %v1019_v9 = vld [vmem:[%s1759_s3 + $0x150] sm:$0xff] }
  0x10   :  { %143 = vmatpush.msra.mxu3 %v126_v12  ;;  %182 = vmatpush.msrb.mxu0 %v992_v22  ;;  %v109_v41 = vperm.slane %v107_v40, 0  ;;  %v110_v45 = vperm.slane %v107_v40, 1  ;;  %v204_v49 = vld [vmem:[%s1763_s5] sm:$0x3f]  ;;  %v1020_v8 = vld [vmem:[%s1759_s3 + $0x158] sm:$0xff]  ;;  %v1018_v10 = vld [vmem:[%s1759_s3 + $0x148] sm:$0xff] }
  0x11   :  { %v206_v50 = vrot.slane %v204_v49, 4  ;;  %v266_v51 = vld.sshfl [vmem:[#allocation1] sm:$0xff pattern:$0x75316420]  ;;  %v1016_v12 = vld [vmem:[%s1759_s3 + $0x138] sm:$0xff]  ;;  %v1039_v22 = vld [vmem:[%s1759_s3 + $0x1e8] sm:$0xff] }
  0x12   :  { %144 = vmatpush.msra.mxu3 %v125_v13  ;;  %183 = vmatpush.msrb.mxu0 %v991_v24  ;;  %v35_v33 = vld.sshfl [vmem:[#allocation1 + $0x10] sm:$0xff pattern:$0x75316420]  ;;  %v1147_v52 = vld [vmem:[%s1761_s4] ss:$0 sm:$0xff]  ;;  %v1012_v20 = vld [vmem:[%s1759_s3 + $0x118] sm:$0xff] }
  0x13   :  { %977 = vmatpush.msk.msrb.mxu2 %vm40_vm0, %v35_v33  ;;  %265 = vst [vmem:[#allocation1 + $0x10] ss:$2 sm:$0xff] %v1001_v31  ;;  %996 = vmatpush.msk.msra.mxu1 %vm211_vm2, %v206_v50  ;;  %v1148_v57 = vld [vmem:[%s1761_s4 + $0x1] ss:$0 sm:$0xff]  ;;  %v1015_v13 = vld [vmem:[%s1759_s3 + $0x130] sm:$0xff]  ;;  %v1037_v24 = vld [vmem:[%s1759_s3 + $0x1d8] sm:$0xff] }
  0x14   :  { %145 = vmatpush.msra.mxu3 %v124_v14  ;;  %184 = vmatpush.msrb.mxu0 %v990_v25  ;;  %v267_v0 = vld.sshfl [vmem:[#allocation1 + $0x8] sm:$0xff pattern:$0x75316420]  ;;  %v1050_v3 = vld [vmem:[%s1758_s1 + $0x20] sm:$0xf]  ;;  %v1036_v25 = vld [vmem:[%s1759_s3 + $0x1d0] sm:$0xff] }
  0x15   :  { %978 = vmatmul.msk.f32.vlgmr.msrb.gmra.mxu2 %vm36_vm1, %v1232_v6  ;;  %1002 = vmatpush.msk.msrb.mxu1 %vm40_vm0, %v266_v51  ;;  %497 = vst [vmem:[#allocation1] ss:$2 sm:$0xff] %v1049_v1  ;;  %v1021_v7 = vld [vmem:[%s1759_s3 + $0x160] sm:$0xff]  ;;  %v1014_v14 = vld [vmem:[%s1759_s3 + $0x128] sm:$0xff] }
  0x16   :  { %146 = vmatpush.msra.mxu3 %v123_v15  ;;  %185 = vmatpush.msrb.mxu0 %v989_v26  ;;  %v1017_v11 = vld [vmem:[%s1759_s3 + $0x140] sm:$0xff]  ;;  %v1035_v26 = vld [vmem:[%s1759_s3 + $0x1c8] sm:$0xff] }
  0x17   :  { %998 = vmatpush.msk.msra.mxu2 %vm40_vm0, %v204_v49  ;;  %v1034_v27 = vld [vmem:[%s1759_s3 + $0x1c0] sm:$0xff]  ;;  %v1031_v31 = vld [vmem:[%s1759_s3 + $0x1a8] sm:$0xff] }
  0x18   :  { %147 = vmatpush.msra.mxu3 %v122_v16  ;;  %186 = vmatpush.msrb.mxu0 %v988_v28  ;;  %v1013_v16 = vld [vmem:[%s1759_s3 + $0x120] sm:$0xff]  ;;  %v1033_v28 = vld [vmem:[%s1759_s3 + $0x1b8] sm:$0xff] }
  0x19   :  { %1004 = vmatpush.msk.msrb.mxu2 %vm40_vm0, %v267_v0  ;;  %v1030_v33 = vld [vmem:[%s1759_s3 + $0x1a0] sm:$0xff] }
  0x1a   :  { %148 = vmatpush.msra.mxu3 %v121_v17  ;;  %187 = vmatpush.msrb.mxu0 %v987_v29  ;;  %v268_v2 = vld.sshfl [vmem:[#allocation1 + $0x10] sm:$0xff pattern:$0x75316420]  ;;  %v1149_v50 = vld [vmem:[%s1761_s4 + $0x2] ss:$0 sm:$0xff]  ;;  %v1098_v1 = vld [vmem:[%s1758_s1 + $0x24] sm:$0xff] }
  0x1b   :  { %499 = vst [vmem:[#allocation1 + $0x10] ss:$2 sm:$0xff] %v1050_v3  ;;  %v1032_v29 = vld [vmem:[%s1759_s3 + $0x1b0] sm:$0xff] }
  0x1c   :  { %149 = vmatpush.msra.mxu3 %v120_v18  ;;  %188 = vmatpush.msrb.mxu0 %v986_v30  ;;  %v1011_v30 = vld [vmem:[%s1759_s3 + $0x110] sm:$0xff]  ;;  %v501_v0 = vld.sshfl [vmem:[#allocation1 + $0x8] sm:$0xff pattern:$0x75316420] }
  0x1d   :  { %999 = vmatmul.msk.f32.vlgmr.msra.gmra.mxu2 %vm36_vm1, %v1232_v6  ;;  %v1022_v6 = vld [vmem:[%s1759_s3 + $0x168] sm:$0xff] }
  0x1e   :  { %150 = vmatpush.msra.mxu3 %v119_v19  ;;  %189 = vmatpush.msrb.mxu0 %v985_v32  ;;  %v1041_v19 = vld [vmem:[%s1759_s3 + $0x1f8] sm:$0xff]  ;;  %v1010_v32 = vld [vmem:[%s1759_s3 + $0x108] sm:$0xff] }
  0x1f   :  { %371 = vmatpush.msra.mxu2 %v1024_v4  ;;  %v1099_v4 = vld [vmem:[%s1758_s1 + $0x2c] sm:$0xf] }
  0x20   :  { %151 = vmatpush.msra.mxu3 %v118_v21  ;;  %190 = vmatpush.msrb.mxu0 %v984_v34  ;;  %v1040_v21 = vld [vmem:[%s1759_s3 + $0x1f0] sm:$0xff]  ;;  %v1009_v34 = vld [vmem:[%s1759_s3 + $0x100] sm:$0xff] }
  0x21   :  { %372 = vmatpush.msra.mxu2 %v1023_v5  ;;  %v1090_v5 = vld [vmem:[%s1759_s3 + $0x2f8] sm:$0xff] }
  0x22   :  { %152 = vmatpush.msra.mxu3 %v117_v23  ;;  %191 = vmatpush.msrb.mxu0 %v983_v35  ;;  %v1038_v23 = vld [vmem:[%s1759_s3 + $0x1e0] sm:$0xff]  ;;  %v1029_v35 = vld [vmem:[%s1759_s3 + $0x198] sm:$0xff]  ;;  %v502_v3 = vld.sshfl [vmem:[#allocation1 + $0x10] sm:$0xff pattern:$0x75316420] }
  0x23   :  { %373 = vmatpush.msra.mxu2 %v1022_v6  ;;  %733 = vst [vmem:[#allocation1 + $0x10] ss:$2 sm:$0xff] %v1099_v4  ;;  %v1089_v6 = vld [vmem:[%s1759_s3 + $0x2f0] sm:$0xff] }
  0x24   :  { %192 = vmatpush.msrb.mxu0 %v982_v36  ;;  %v1028_v36 = vld [vmem:[%s1759_s3 + $0x190] sm:$0xff] }
  0x25   :  { %374 = vmatpush.msra.mxu2 %v1021_v7  ;;  %v1073_v7 = vld [vmem:[%s1759_s3 + $0x278] sm:$0xff] }
  0x26   :  { %193 = vmatpush.msrb.mxu0 %v981_v37  ;;  %v1027_v37 = vld [vmem:[%s1759_s3 + $0x188] sm:$0xff] }
  0x27   :  { %375 = vmatpush.msra.mxu2 %v1020_v8  ;;  %v1072_v8 = vld [vmem:[%s1759_s3 + $0x270] sm:$0xff] }
  0x28   :  { %194 = vmatpush.msrb.mxu0 %v980_v38  ;;  %v1026_v38 = vld [vmem:[%s1759_s3 + $0x180] sm:$0xff] }
  0x29   :  { %376 = vmatpush.msra.mxu2 %v1019_v9  ;;  %v1088_v9 = vld [vmem:[%s1759_s3 + $0x2e8] sm:$0xff] }
  0x2a   :  { %195 = vmatpush.msrb.mxu0 %v979_v39  ;;  %v1008_v39 = vld [vmem:[%s1762_s2 + $0x2] sm:$0x3]  ;;  %v736_v4 = vld.sshfl [vmem:[#allocation1 + $0x10] sm:$0xff pattern:$0x75316420] }
  0x2b   :  { %377 = vmatpush.msra.mxu2 %v1018_v10  ;;  %v341_v40 = vperm.slane %v1008_v39, 0  ;;  %v1071_v10 = vld [vmem:[%s1759_s3 + $0x268] sm:$0xff] }
  0x2d   :  { %378 = vmatpush.msra.mxu2 %v1017_v11  ;;  %v1087_v11 = vld [vmem:[%s1759_s3 + $0x2e0] sm:$0xff] }
  0x2f   :  { %379 = vmatpush.msra.mxu2 %v1016_v12  ;;  %v1070_v12 = vld [vmem:[%s1759_s3 + $0x260] sm:$0xff] }
  0x31   :  { %380 = vmatpush.msra.mxu2 %v1015_v13  ;;  %v1086_v13 = vld [vmem:[%s1759_s3 + $0x2d8] sm:$0xff] }
  0x33   :  { %381 = vmatpush.msra.mxu2 %v1014_v14  ;;  %v1069_v14 = vld [vmem:[%s1759_s3 + $0x258] sm:$0xff] }
  0x35   :  { %382 = vmatpush.msra.mxu2 %v1013_v16  ;;  %v1068_v16 = vld [vmem:[%s1759_s3 + $0x250] sm:$0xff] }
  0x37   :  { %383 = vmatpush.msra.mxu2 %v1012_v20 }
  0x39   :  { %384 = vmatpush.msra.mxu2 %v1011_v30 }
  0x3b   :  { %385 = vmatpush.msra.mxu2 %v1010_v32  ;;  %v1063_v32 = vld [vmem:[%s1759_s3 + $0x228] sm:$0xff] }
  0x3d   :  { %386 = vmatpush.msra.mxu2 %v1009_v34  ;;  %v1062_v34 = vld [vmem:[%s1759_s3 + $0x220] sm:$0xff] }
  0x88   :  { %v64_v42 = vpop.f32.mrf.mxu0 }
  0x89   :  { %v113_v43 = vadd.f32 %v109_v41, %v64_v42 }
  0x8b   :  { %v115_v44 = vmax.f32 %v113_v43, 0.0 }
  0x8d   :  { %153 = vmatmul.f32.vlgmr.msra.gmra.mxu3 %v115_v44  ;;  %v342_v44 = vperm.slane %v1008_v39, 1  ;;  %v1059_v39 = vld [vmem:[%s1759_s3 + $0x208] sm:$0xff] }
  0x8e   :  { %v84_v46 = vpop.f32.mrf.mxu2 }
  0x8f   :  { %v114_v47 = vadd.f32 %v110_v45, %v84_v46 }
  0x91   :  { %v116_v48 = vmax.f32 %v114_v47, 0.0 }
  0x93   :  { %196 = vmatmul.f32.vlgmr.msrb.gmra.mxu0 %v116_v48  ;;  %v1043_v48 = vld [vmem:[%s1763_s5 + $0x8] sm:$0x3f] }
  0x94   :  { %v441_v49 = vrot.slane %v1043_v48, 4 }
  0x96   :  { %1044 = vmatpush.msk.msra.mxu0 %vm211_vm2, %v441_v49 }
  0x98   :  { %v104_v59 = vpop.f32.mrf.mxu2  ;;  %1046 = vmatpush.msk.msrb.mxu0 %vm40_vm0, %v1043_v48 }
  0xa0   :  { %v253_v15 = vpop.f32.mrf.mxu2 }
 0x110   :  { %v154_v53 = vpop.f32.mrf.mxu3  ;;  %v197_v58 = vpop.f32.mrf.mxu0 }
 0x111   :  { %v155_v54 = vadd.f32 %v1147_v52, %v154_v53  ;;  %v198_v60 = vadd.f32 %v1148_v57, %v197_v58  ;;  %v1150_v57 = vld [vmem:[%s1761_s4 + $0x3] ss:$0 sm:$0xff] }
 0x113   :  { %1155 = vtanh.f32 %v155_v54 }
 0x119   :  { %v1347_v55 = vpop.eup %1155 }
 0x11a   :  { %v200_v56 = vmul.f32 1.442695, %v1347_v55 }
 0x11c   :  { %1157 = vpow2.f32 %v200_v56 }
 0x122   :  { %v1158_v61 = vpop.eup %1157 }
 0x123   :  { %v202_v62 = vmul.f32 %v1158_v61, %v104_v59 }
 0x125   :  { %v203_v63 = vadd.f32 %v202_v62, %v198_v60 }
 0x127   :  { %997 = vmatmul.msk.f32.vlgmr.msra.gmra.mxu1 %vm207_vm3, %v203_v63  ;;  %v500_v63 = vld.sshfl [vmem:[#allocation1] sm:$0xff pattern:$0x75316420] }
 0x128   :  { %1006 = vmatpush.msk.msra.mxu1 %vm40_vm0, %v268_v2  ;;  %1051 = vmatpush.msk.msrb.mxu3 %vm40_vm0, %v500_v63  ;;  %v1498_v2 = vld [vmem:[%s1763_s5 + $0x10] sm:$0x3f]  ;;  %731 = vst [vmem:[#allocation1] ss:$2 sm:$0xff] %v1098_v1 }
 0x129   :  { %v675_v30 = vrot.slane %v1498_v2, 4 }
 0x12a   :  { %1055 = vmatpush.msk.msra.mxu3 %vm40_vm0, %v502_v3 }
 0x12f   :  { %v735_v3 = vld.sshfl [vmem:[#allocation1 + $0x8] sm:$0xff pattern:$0x75316420] }
 0x1a4   :  { %v231_v17 = vpop.f32.mrf.mxu1 }
 0x1a5   :  { %v1398_v18 = vadd.f32 %v253_v15, %v231_v17  ;;  %v1085_v15 = vld [vmem:[%s1759_s3 + $0x2d0] sm:$0xff]  ;;  %v1084_v17 = vld [vmem:[%s1759_s3 + $0x2c8] sm:$0xff] }
 0x1a7   :  { %1003 = vmatmul.msk.f32.vlgmr.msrb.gmra.mxu1 %vm36_vm1, %v1398_v18  ;;  %1005 = vmatmul.msk.f32.vlgmr.msrb.gmra.mxu2 %vm36_vm1, %v1398_v18  ;;  %256 = vst.msk [vmem:[%s1764_s6] sm:$0xff] %vm36_vm1, %v1398_v18 }
 0x1a8   :  { %414 = vmatpush.msrb.mxu1 %v1041_v19  ;;  %648 = vmatpush.msrb.mxu2 %v1090_v5  ;;  %v1083_v19 = vld [vmem:[%s1759_s3 + $0x2c0] sm:$0xff]  ;;  %v1122_v5 = vld [vmem:[%s1759_s3 + $0x378] sm:$0xff] }
 0x1aa   :  { %415 = vmatpush.msrb.mxu1 %v1040_v21  ;;  %649 = vmatpush.msrb.mxu2 %v1089_v6  ;;  %v1066_v21 = vld [vmem:[%s1759_s3 + $0x240] sm:$0xff]  ;;  %v1121_v6 = vld [vmem:[%s1759_s3 + $0x370] sm:$0xff] }
 0x1ac   :  { %416 = vmatpush.msrb.mxu1 %v1039_v22  ;;  %650 = vmatpush.msrb.mxu2 %v1088_v9  ;;  %v1082_v22 = vld [vmem:[%s1759_s3 + $0x2b8] sm:$0xff] }
 0x1ad   :  { %v1118_v9 = vld [vmem:[%s1759_s3 + $0x358] sm:$0xff] }
 0x1ae   :  { %417 = vmatpush.msrb.mxu1 %v1038_v23  ;;  %651 = vmatpush.msrb.mxu2 %v1087_v11  ;;  %v1065_v23 = vld [vmem:[%s1759_s3 + $0x238] sm:$0xff]  ;;  %v1116_v11 = vld [vmem:[%s1759_s3 + $0x348] sm:$0xff] }
 0x1af   :  { %1007 = vmatmul.msk.f32.vlgmr.msra.gmra.mxu1 %vm36_vm1, %v1398_v18 }
 0x1b0   :  { %418 = vmatpush.msrb.mxu1 %v1037_v24  ;;  %652 = vmatpush.msrb.mxu2 %v1086_v13  ;;  %v1081_v24 = vld [vmem:[%s1759_s3 + $0x2b0] sm:$0xff]  ;;  %v1114_v13 = vld [vmem:[%s1759_s3 + $0x338] sm:$0xff] }
 0x1b2   :  { %419 = vmatpush.msrb.mxu1 %v1036_v25  ;;  %653 = vmatpush.msrb.mxu2 %v1085_v15  ;;  %v1064_v25 = vld [vmem:[%s1759_s3 + $0x230] sm:$0xff] }
 0x1b4   :  { %420 = vmatpush.msrb.mxu1 %v1035_v26  ;;  %654 = vmatpush.msrb.mxu2 %v1084_v17  ;;  %v1080_v26 = vld [vmem:[%s1759_s3 + $0x2a8] sm:$0xff] }
 0x1b6   :  { %421 = vmatpush.msrb.mxu1 %v1034_v27  ;;  %655 = vmatpush.msrb.mxu2 %v1083_v19  ;;  %v1079_v27 = vld [vmem:[%s1759_s3 + $0x2a0] sm:$0xff]  ;;  %v1138_v19 = vld [vmem:[%s1759_s3 + $0x3f0] sm:$0xff] }
 0x1b8   :  { %422 = vmatpush.msrb.mxu1 %v1033_v28  ;;  %656 = vmatpush.msrb.mxu2 %v1082_v22  ;;  %v1135_v22 = vld [vmem:[%s1759_s3 + $0x3d8] sm:$0xff] }
 0x1ba   :  { %423 = vmatpush.msrb.mxu1 %v1032_v29  ;;  %657 = vmatpush.msrb.mxu2 %v1081_v24  ;;  %v1133_v24 = vld [vmem:[%s1759_s3 + $0x3c8] sm:$0xff] }
 0x1bc   :  { %424 = vmatpush.msrb.mxu1 %v1031_v31  ;;  %658 = vmatpush.msrb.mxu2 %v1080_v26  ;;  %v1078_v31 = vld [vmem:[%s1759_s3 + $0x298] sm:$0xff] }
 0x1bd   :  { %v1131_v26 = vld [vmem:[%s1759_s3 + $0x3b8] sm:$0xff] }
 0x1be   :  { %425 = vmatpush.msrb.mxu1 %v1030_v33  ;;  %659 = vmatpush.msrb.mxu2 %v1079_v27  ;;  %v1077_v33 = vld [vmem:[%s1759_s3 + $0x290] sm:$0xff] }
 0x1bf   :  { %v1130_v27 = vld [vmem:[%s1759_s3 + $0x3b0] sm:$0xff] }
 0x1c0   :  { %426 = vmatpush.msrb.mxu1 %v1029_v35  ;;  %660 = vmatpush.msrb.mxu2 %v1078_v31  ;;  %v1076_v35 = vld [vmem:[%s1759_s3 + $0x288] sm:$0xff] }
 0x1c1   :  { %v1112_v31 = vld [vmem:[%s1759_s3 + $0x328] sm:$0xff] }
 0x1c2   :  { %427 = vmatpush.msrb.mxu1 %v1028_v36  ;;  %661 = vmatpush.msrb.mxu2 %v1077_v33  ;;  %v1061_v36 = vld [vmem:[%s1759_s3 + $0x218] sm:$0xff]  ;;  %v1111_v33 = vld [vmem:[%s1759_s3 + $0x320] sm:$0xff] }
 0x1c4   :  { %428 = vmatpush.msrb.mxu1 %v1027_v37  ;;  %662 = vmatpush.msrb.mxu2 %v1076_v35  ;;  %v1075_v37 = vld [vmem:[%s1759_s3 + $0x280] sm:$0xff]  ;;  %v1110_v35 = vld [vmem:[%s1759_s3 + $0x318] sm:$0xff] }
 0x1c6   :  { %429 = vmatpush.msrb.mxu1 %v1026_v38  ;;  %663 = vmatpush.msrb.mxu2 %v1075_v37  ;;  %v1060_v38 = vld [vmem:[%s1759_s3 + $0x210] sm:$0xff] }
 0x1c7   :  { %v1109_v37 = vld [vmem:[%s1759_s3 + $0x310] sm:$0xff] }
 0x1c8   :  { %1095 = vmatpush.msk.msra.mxu1 %vm40_vm0, %v1498_v2 }
 0x224   :  { %v295_v41 = vpop.f32.mrf.mxu1 }
 0x225   :  { %v345_v42 = vadd.f32 %v341_v40, %v295_v41  ;;  %v1058_v40 = vld [vmem:[%s1759_s3 + $0x200] sm:$0xff] }
 0x226   :  { %v1057_v41 = vld [vmem:[%s1762_s2 + $0x4] sm:$0x3] }
 0x227   :  { %v347_v43 = vmax.f32 %v345_v42, 0.0  ;;  %v576_v42 = vperm.slane %v1057_v41, 1 }
 0x229   :  { %387 = vmatmul.f32.vlgmr.msra.gmra.mxu2 %v347_v43 }
 0x22a   :  { %v315_v45 = vpop.f32.mrf.mxu2 }
 0x22b   :  { %v346_v46 = vadd.f32 %v342_v44, %v315_v45 }
 0x22c   :  { %v335_v53 = vpop.f32.mrf.mxu1 }
 0x22d   :  { %v348_v47 = vmax.f32 %v346_v46, 0.0  ;;  %v575_v46 = vperm.slane %v1057_v41, 0 }
 0x22f   :  { %430 = vmatmul.f32.vlgmr.msrb.gmra.mxu1 %v348_v47 }
 0x230   :  { %1102 = vmatpush.msk.msrb.mxu1 %vm40_vm0, %v735_v3 }
 0x2ac   :  { %v388_v51 = vpop.f32.mrf.mxu2  ;;  %v431_v58 = vpop.f32.mrf.mxu1 }
 0x2ad   :  { %v389_v52 = vadd.f32 %v1149_v50, %v388_v51  ;;  %v432_v60 = vadd.f32 %v1150_v57, %v431_v58  ;;  %v734_v50 = vld.sshfl [vmem:[#allocation1] sm:$0xff pattern:$0x75316420] }
 0x2ae   :  { %v1151_v51 = vld [vmem:[%s1761_s4 + $0x4] ss:$0 sm:$0xff] }
 0x2af   :  { %1159 = vtanh.f32 %v389_v52 }
 0x2b5   :  { %v1482_v54 = vpop.eup %1159 }
 0x2b6   :  { %v434_v56 = vmul.f32 1.442695, %v1482_v54 }
 0x2b8   :  { %1161 = vpow2.f32 %v434_v56  ;;  %v491_v56 = vadd.f32 %v1482_v54, %v1347_v55  ;;  %v1141_v55 = vld [vmem:[%s1763_s5 + $0x18] sm:$0x3f] }
 0x2b9   :  { %v909_v54 = vrot.slane %v1141_v55, 4  ;;  %1144 = vmatpush.msk.msra.mxu2 %vm40_vm0, %v1141_v55 }
 0x2be   :  { %v1162_v59 = vpop.eup %1161 }
 0x2bf   :  { %v436_v61 = vmul.f32 %v1162_v59, %v335_v53 }
 0x2c1   :  { %v437_v62 = vadd.f32 %v436_v61, %v432_v60  ;;  %v1152_v60 = vld [vmem:[%s1761_s4 + $0x5] ss:$0 sm:$0xff] }
 0x2c3   :  { %1045 = vmatmul.msk.f32.vlgmr.msra.gmra.mxu0 %vm207_vm3, %v437_v62 }
 0x2c4   :  { %1053 = vmatpush.msk.msra.mxu0 %vm40_vm0, %v501_v0 }
 0x2cb   :  { %1047 = vmatmul.msk.f32.vlgmr.msrb.gmra.mxu0 %vm36_vm1, %v1398_v18  ;;  %v1067_v18 = vld [vmem:[%s1759_s3 + $0x248] sm:$0xff] }
 0x2cc   :  { %605 = vmatpush.msrb.mxu0 %v1073_v7  ;;  %v1120_v7 = vld [vmem:[%s1759_s3 + $0x368] sm:$0xff] }
 0x2ce   :  { %606 = vmatpush.msrb.mxu0 %v1072_v8  ;;  %v1119_v8 = vld [vmem:[%s1759_s3 + $0x360] sm:$0xff] }
 0x2d0   :  { %607 = vmatpush.msrb.mxu0 %v1071_v10  ;;  %v1117_v10 = vld [vmem:[%s1759_s3 + $0x350] sm:$0xff] }
 0x2d2   :  { %608 = vmatpush.msrb.mxu0 %v1070_v12  ;;  %v1115_v12 = vld [vmem:[%s1759_s3 + $0x340] sm:$0xff] }
 0x2d4   :  { %609 = vmatpush.msrb.mxu0 %v1069_v14  ;;  %v1113_v14 = vld [vmem:[%s1759_s3 + $0x330] sm:$0xff] }
 0x2d6   :  { %610 = vmatpush.msrb.mxu0 %v1068_v16 }
 0x2d8   :  { %611 = vmatpush.msrb.mxu0 %v1067_v18  ;;  %v1139_v18 = vld [vmem:[%s1759_s3 + $0x3f8] sm:$0xff] }
 0x2da   :  { %612 = vmatpush.msrb.mxu0 %v1066_v21  ;;  %v1136_v21 = vld [vmem:[%s1759_s3 + $0x3e0] sm:$0xff] }
 0x2dc   :  { %613 = vmatpush.msrb.mxu0 %v1065_v23  ;;  %v1134_v23 = vld [vmem:[%s1759_s3 + $0x3d0] sm:$0xff] }
 0x2de   :  { %614 = vmatpush.msrb.mxu0 %v1064_v25  ;;  %v1132_v25 = vld [vmem:[%s1759_s3 + $0x3c0] sm:$0xff] }
 0x2e0   :  { %615 = vmatpush.msrb.mxu0 %v1063_v32  ;;  %v1126_v32 = vld [vmem:[%s1759_s3 + $0x390] sm:$0xff] }
 0x2e2   :  { %616 = vmatpush.msrb.mxu0 %v1062_v34  ;;  %v1125_v34 = vld [vmem:[%s1759_s3 + $0x388] sm:$0xff] }
 0x2e4   :  { %617 = vmatpush.msrb.mxu0 %v1061_v36  ;;  %v1124_v36 = vld [vmem:[%s1759_s3 + $0x380] sm:$0xff] }
 0x2e6   :  { %618 = vmatpush.msrb.mxu0 %v1060_v38  ;;  %v1108_v38 = vld [vmem:[%s1759_s3 + $0x308] sm:$0xff] }
 0x2e8   :  { %619 = vmatpush.msrb.mxu0 %v1059_v39  ;;  %v1107_v39 = vld [vmem:[%s1759_s3 + $0x300] sm:$0xff] }
 0x2ea   :  { %620 = vmatpush.msrb.mxu0 %v1058_v40  ;;  %v1106_v40 = vld [vmem:[%s1762_s2 + $0x6] sm:$0x3] }
 0x2eb   :  { %v810_v41 = vperm.slane %v1106_v40, 1 }
 0x340   :  { %v464_v20 = vpop.f32.mrf.mxu0 }
 0x348   :  { %v486_v28 = vpop.f32.mrf.mxu0 }
 0x349   :  { %v487_v29 = vadd.f32 %v486_v28, %v464_v20  ;;  %v1137_v20 = vld [vmem:[%s1759_s3 + $0x3e8] sm:$0xff] }
 0x34a   :  { %v1129_v28 = vld [vmem:[%s1759_s3 + $0x3a8] sm:$0xff] }
 0x34b   :  { %1052 = vmatmul.msk.f32.vlgmr.msrb.gmra.mxu3 %vm36_vm1, %v487_v29  ;;  %1054 = vmatmul.msk.f32.vlgmr.msra.gmra.mxu0 %vm36_vm1, %v487_v29  ;;  %1048 = vst.msk [vmem:[%s1764_s6 + $0x8] sm:$0xff] %vm36_vm1, %v487_v29 }
 0x34c   :  { %1096 = vmatmul.msk.f32.vlgmr.msra.gmra.mxu1 %vm36_vm1, %v487_v29  ;;  %1093 = vmatpush.msk.msrb.mxu3 %vm211_vm2, %v675_v30  ;;  %v1127_v30 = vld [vmem:[%s1759_s3 + $0x398] sm:$0xff] }
 0x34d   :  { %1142 = vmatpush.msk.msra.mxu0 %vm211_vm2, %v909_v54  ;;  %839 = vmatpush.msra.mxu1 %v1122_v5 }
 0x34f   :  { %840 = vmatpush.msra.mxu1 %v1121_v6 }
 0x351   :  { %841 = vmatpush.msra.mxu1 %v1120_v7 }
 0x353   :  { %1056 = vmatmul.msk.f32.vlgmr.msra.gmra.mxu3 %vm36_vm1, %v487_v29  ;;  %842 = vmatpush.msra.mxu1 %v1119_v8  ;;  %v1128_v29 = vld [vmem:[%s1759_s3 + $0x3a0] sm:$0xff] }
 0x354   :  { %1100 = vmatpush.msk.msra.mxu3 %vm40_vm0, %v734_v50 }
 0x355   :  { %843 = vmatpush.msra.mxu1 %v1118_v9 }
 0x357   :  { %844 = vmatpush.msra.mxu1 %v1117_v10 }
 0x359   :  { %845 = vmatpush.msra.mxu1 %v1116_v11 }
 0x35b   :  { %846 = vmatpush.msra.mxu1 %v1115_v12 }
 0x35d   :  { %847 = vmatpush.msra.mxu1 %v1114_v13 }
 0x35f   :  { %848 = vmatpush.msra.mxu1 %v1113_v14 }
 0x361   :  { %849 = vmatpush.msra.mxu1 %v1112_v31 }
 0x363   :  { %850 = vmatpush.msra.mxu1 %v1111_v33 }
 0x365   :  { %851 = vmatpush.msra.mxu1 %v1110_v35 }
 0x367   :  { %852 = vmatpush.msra.mxu1 %v1109_v37 }
 0x369   :  { %853 = vmatpush.msra.mxu1 %v1108_v38 }
 0x36b   :  { %854 = vmatpush.msra.mxu1 %v1107_v39 }
 0x3c8   :  { %v549_v43 = vpop.f32.mrf.mxu0 }
 0x3c9   :  { %v580_v44 = vadd.f32 %v576_v42, %v549_v43  ;;  %v720_v15 = vpop.f32.mrf.mxu1 }
 0x3cb   :  { %v582_v45 = vmax.f32 %v580_v44, 0.0 }
 0x3cd   :  { %664 = vmatmul.f32.vlgmr.msrb.gmra.mxu2 %v582_v45  ;;  %v809_v45 = vperm.slane %v1106_v40, 0 }
 0x3ce   :  { %v529_v47 = vpop.f32.mrf.mxu3 }
 0x3cf   :  { %v579_v48 = vadd.f32 %v575_v46, %v529_v47 }
 0x3d1   :  { %v581_v49 = vmax.f32 %v579_v48, 0.0 }
 0x3d3   :  { %621 = vmatmul.f32.vlgmr.msrb.gmra.mxu0 %v581_v49  ;;  %v1153_v49 = vld [vmem:[%s1761_s4 + $0x6] ss:$0 sm:$0xff] }
 0x3d6   :  { %v569_v63 = vpop.f32.mrf.mxu3 }
 0x450   :  { %v622_v52 = vpop.f32.mrf.mxu0  ;;  %v665_v61 = vpop.f32.mrf.mxu2 }
 0x451   :  { %v623_v53 = vadd.f32 %v1151_v51, %v622_v52  ;;  %v666_v0 = vadd.f32 %v1152_v60, %v665_v61  ;;  %v1154_v60 = vld [vmem:[%s1761_s4 + $0x7] ss:$0 sm:$0xff] }
 0x453   :  { %1163 = vtanh.f32 %v623_v53 }
 0x459   :  { %v1164_v57 = vpop.eup %1163 }
 0x45a   :  { %v668_v58 = vmul.f32 1.442695, %v1164_v57  ;;  %v1622_v59 = vadd.f32 %v1164_v57, %v491_v56 }
 0x45c   :  { %1165 = vpow2.f32 %v668_v58 }
 0x462   :  { %v1166_v62 = vpop.eup %1165 }
 0x463   :  { %v670_v1 = vmul.f32 %v1166_v62, %v569_v63 }
 0x465   :  { %v671_v2 = vadd.f32 %v670_v1, %v666_v0 }
 0x467   :  { %1094 = vmatmul.msk.f32.vlgmr.msrb.gmra.mxu3 %vm207_vm3, %v671_v2 }
 0x468   :  { %1104 = vmatpush.msk.msrb.mxu3 %vm40_vm0, %v736_v4 }
 0x4ea   :  { %v698_v16 = vpop.f32.mrf.mxu3 }
 0x4eb   :  { %v721_v17 = vadd.f32 %v720_v15, %v698_v16 }
 0x4ed   :  { %1101 = vmatmul.msk.f32.vlgmr.msra.gmra.mxu3 %vm36_vm1, %v721_v17  ;;  %1103 = vmatmul.msk.f32.vlgmr.msrb.gmra.mxu1 %vm36_vm1, %v721_v17  ;;  %1097 = vst.msk [vmem:[%s1764_s6 + $0x10] sm:$0xff] %vm36_vm1, %v721_v17 }
 0x4ee   :  { %1145 = vmatmul.msk.f32.vlgmr.msra.gmra.mxu2 %vm36_vm1, %v721_v17  ;;  %882 = vmatpush.msra.mxu3 %v1139_v18 }
 0x4f0   :  { %883 = vmatpush.msra.mxu3 %v1138_v19 }
 0x4f2   :  { %884 = vmatpush.msra.mxu3 %v1137_v20 }
 0x4f4   :  { %885 = vmatpush.msra.mxu3 %v1136_v21 }
 0x4f5   :  { %1105 = vmatmul.msk.f32.vlgmr.msrb.gmra.mxu3 %vm36_vm1, %v721_v17 }
 0x4f6   :  { %886 = vmatpush.msra.mxu3 %v1135_v22 }
 0x4f8   :  { %887 = vmatpush.msra.mxu3 %v1134_v23 }
 0x4fa   :  { %888 = vmatpush.msra.mxu3 %v1133_v24 }
 0x4fc   :  { %889 = vmatpush.msra.mxu3 %v1132_v25 }
 0x4fe   :  { %890 = vmatpush.msra.mxu3 %v1131_v26 }
 0x500   :  { %891 = vmatpush.msra.mxu3 %v1130_v27 }
 0x502   :  { %892 = vmatpush.msra.mxu3 %v1129_v28 }
 0x504   :  { %893 = vmatpush.msra.mxu3 %v1128_v29 }
 0x506   :  { %894 = vmatpush.msra.mxu3 %v1127_v30 }
 0x508   :  { %895 = vmatpush.msra.mxu3 %v1126_v32 }
 0x50a   :  { %896 = vmatpush.msra.mxu3 %v1125_v34 }
 0x50c   :  { %897 = vmatpush.msra.mxu3 %v1124_v36 }
 0x56a   :  { %v783_v42 = vpop.f32.mrf.mxu1 }
 0x56b   :  { %v814_v43 = vadd.f32 %v810_v41, %v783_v42 }
 0x56d   :  { %v816_v44 = vmax.f32 %v814_v43, 0.0 }
 0x56f   :  { %898 = vmatmul.f32.vlgmr.msra.gmra.mxu3 %v816_v44 }
 0x570   :  { %v763_v46 = vpop.f32.mrf.mxu3 }
 0x571   :  { %v813_v47 = vadd.f32 %v809_v45, %v763_v46 }
 0x573   :  { %v815_v48 = vmax.f32 %v813_v47, 0.0 }
 0x575   :  { %855 = vmatmul.f32.vlgmr.msra.gmra.mxu1 %v815_v48 }
 0x578   :  { %v803_v52 = vpop.f32.mrf.mxu3 }
 0x5f2   :  { %v856_v50 = vpop.f32.mrf.mxu1  ;;  %v899_v61 = vpop.f32.mrf.mxu3 }
 0x5f3   :  { %v857_v51 = vadd.f32 %v1153_v49, %v856_v50  ;;  %v900_v63 = vadd.f32 %v1154_v60, %v899_v61 }
 0x5f5   :  { %1167 = vtanh.f32 %v857_v51 }
 0x5fb   :  { %v1168_v53 = vpop.eup %1167 }
 0x5fc   :  { %v902_v56 = vmul.f32 1.442695, %v1168_v53  ;;  %v959_v57 = vadd.f32 %v1168_v53, %v1622_v59  ;;  %v954_v59 = vpop.f32.mrf.mxu2 }
 0x5fe   :  { %1169 = vpow2.f32 %v902_v56  ;;  %v960_v58 = vsel %vm207_vm3, %v959_v57, 0.0 }
 0x5ff   :  { %961 = vadd.xlane.f32.xlu0 %v960_v58 }
 0x604   :  { %v1170_v62 = vpop.eup %1169 }
 0x605   :  { %v904_v0 = vmul.f32 %v1170_v62, %v803_v52 }
 0x607   :  { %v905_v1 = vadd.f32 %v904_v0, %v900_v63 }
 0x609   :  { %1143 = vmatmul.msk.f32.vlgmr.msra.gmra.mxu0 %vm207_vm3, %v905_v1 }
 0x672   :  { %v962_v2 = vpop.xlane.xlu0 %961 }
 0x673   :  { %964 = vst.msk [vmem:[%s1765_s7] sm:$0xff] %vm963_vm4, %v962_v2 }
 0x686   :  { %v932_v3 = vpop.f32.mrf.mxu0 }
 0x687   :  { %v955_v55 = vadd.f32 %v954_v59, %v932_v3 }
 0x689   :  { %1146 = vst.msk [vmem:[%s1764_s6 + $0x18] sm:$0xff] %vm36_vm1, %v955_v55 }

</bundles_post_ra>
